<compile_context>
chip_gen: v7x
topology: tpu7x:2x2x1
jax: 0.10.0
libtpu: 0.0.40
codegen_flags: <defaults>
</compile_context>

<pallas_src>
import functools

import jax
import jax.numpy as jnp
from jax.experimental import pallas as pl
from jax.experimental.pallas import tpu as pltpu


_VMEM_LIMIT = 40 * 1024 * 1024  # < v7x 64 MiB physical; raises v5e/v6e defaults


def _pick_tile(dim, target, align):
    """Largest tile <= target that is a multiple of `align` and divides `dim`.
    Falls back to the full dim (always a legal BlockSpec block size)."""
    if dim <= target:
        return dim
    t = (target // align) * align
    while t >= align:
        if dim % t == 0:
            return t
        t -= align
    return dim


def _select_exp_dtype():
    """bf16 exp on chips with a bf16 EUP (v6e/v7x); fp32 elsewhere (v5e/v4/...)."""
    try:
        kind = jax.devices()[0].device_kind.lower()
    except Exception:
        return jnp.float32
    if any(t in kind for t in ("v6", "v7")):
        return jnp.bfloat16
    return jnp.float32


_EXP_DTYPE = _select_exp_dtype()


# --------------------------- fused/tiled linear -----------------------------
def _stacked_linear_kernel(x_ref, w_ref, b_ref, o_ref, acc_ref):
    # grid = (G, M/tm, N/tn, K/tk); blocks: x (1,tm,tk), w (1,tk,tn), b (1,1,tn)
    k = pl.program_id(3)

    @pl.when(k == 0)
    def _init():
        acc_ref[...] = jnp.zeros_like(acc_ref)

    acc_ref[...] += jnp.dot(x_ref[0], w_ref[0],
                            preferred_element_type=jnp.float32)

    @pl.when(k == pl.num_programs(3) - 1)
    def _epilogue():
        # bias added once, in the last-K-step epilogue (fp32)
        o_ref[0] = (acc_ref[...] + b_ref[0]).astype(o_ref.dtype)


def stacked_linear(x, w, b, *, out_dtype, m_tile=512, n_tile=512, k_tile=512):
    """y[g] = x[g] @ w[g] + b[g]  for g in range(G), in a single pallas_call.

    x: (G, M, K) bf16, w: (G, K, N) bf16, b: (G, 1, N) fp32.
    With default 512 tiles the common D<=512 case has NO K grid axis at all.
    """
    G, M, K = x.shape
    N = w.shape[-1]
    tm = _pick_tile(M, m_tile, 8)
    tn = _pick_tile(N, n_tile, 128)
    tk = _pick_tile(K, k_tile, 128)
    grid = (G, M // tm, N // tn, K // tk)

    return pl.pallas_call(
        _stacked_linear_kernel,
        out_shape=jax.ShapeDtypeStruct((G, M, N), out_dtype),
        grid=grid,
        in_specs=[
            pl.BlockSpec((1, tm, tk), lambda g, i, j, k: (g, i, k)),
            pl.BlockSpec((1, tk, tn), lambda g, i, j, k: (g, k, j)),
            pl.BlockSpec((1, 1, tn), lambda g, i, j, k: (g, 0, j)),
        ],
        out_specs=pl.BlockSpec((1, tm, tn), lambda g, i, j, k: (g, i, j)),
        scratch_shapes=[pltpu.VMEM((tm, tn), jnp.float32)],
        compiler_params=pltpu.CompilerParams(
            dimension_semantics=("parallel", "parallel", "parallel", "arbitrary"),
            vmem_limit_bytes=_VMEM_LIMIT,
        ),
    )(x, w, b)


# --------------------- flash-style scaled dot-product attention -------------
def _flash_attn_kernel(q_ref, k_ref, v_ref, o_ref, m_sc, l_sc, acc_sc, *, exp_dtype):
    kv = pl.program_id(3)

    @pl.when(kv == 0)
    def _init():
        m_sc[...] = jnp.full_like(m_sc, -jnp.inf)
        l_sc[...] = jnp.zeros_like(l_sc)
        acc_sc[...] = jnp.zeros_like(acc_sc)

    q = q_ref[0, 0]       # (tq, d)  bf16; softmax scale pre-folded into W_q/b_q
    k = k_ref[0, 0]       # (tkv, d) bf16
    v = v_ref[0, 0]       # (tkv, d) bf16

    # Scores: contract last dims directly (no k.T relayout); fp32 on the MXU.
    s = jax.lax.dot_general(q, k, (((1,), (1,)), ((), ())),
                            preferred_element_type=jnp.float32)      # (tq, tkv)

    m_prev = m_sc[...]
    m_new = jnp.maximum(m_prev, s.max(axis=-1, keepdims=True))
    alpha = jnp.exp(m_prev - m_new)                                  # fp32, tiny
    p = jnp.exp((s - m_new).astype(exp_dtype))                       # bf16 EUP on v6e/v7x
    l_sc[...] = alpha * l_sc[...] + jnp.sum(p.astype(jnp.float32),
                                            axis=-1, keepdims=True)  # fp32 accumulation
    acc_sc[...] = alpha * acc_sc[...] + jnp.dot(
        p.astype(v.dtype), v, preferred_element_type=jnp.float32)
    m_sc[...] = m_new

    @pl.when(kv == pl.num_programs(3) - 1)
    def _finalize():
        inv_l = pl.reciprocal(l_sc[...], approx=True)   # EUP, essentially free
        # TODO(synk): output last dim d (<128) gives masked stores; a lane-dense
        # (tq*d) store would need an in-kernel relayout, skipped (moderate win).
        o_ref[0, 0] = (acc_sc[...] * inv_l).astype(o_ref.dtype)


def scaled_dot_product_attention(q, k, v, *, q_tile=512, kv_tile=512,
                                 exp_dtype=jnp.float32):
    """q, k, v: (B, H, L, d) bf16 -> (B, H, L, d) bf16.

    Softmax scale must already be folded into q (done in prepare_mha_params).
    """
    B, H, L, d = q.shape
    tq = _pick_tile(L, q_tile, 8)
    tkv = _pick_tile(L, kv_tile, 128)   # lane dim of the score tensor: 128-align
    grid = (B, H, L // tq, L // tkv)

    q_spec = pl.BlockSpec((1, 1, tq, d), lambda b, h, qi, ki: (b, h, qi, 0))
    kv_spec = pl.BlockSpec((1, 1, tkv, d), lambda b, h, qi, ki: (b, h, ki, 0))
    o_spec = pl.BlockSpec((1, 1, tq, d), lambda b, h, qi, ki: (b, h, qi, 0))

    return pl.pallas_call(
        functools.partial(_flash_attn_kernel, exp_dtype=exp_dtype),
        out_shape=jax.ShapeDtypeStruct((B, H, L, d), q.dtype),
        grid=grid,
        in_specs=[q_spec, kv_spec, kv_spec],
        out_specs=o_spec,
        scratch_shapes=[
            pltpu.VMEM((tq, 1), jnp.float32),   # running max
            pltpu.VMEM((tq, 1), jnp.float32),   # running sum
            pltpu.VMEM((tq, d), jnp.float32),   # fp32 accumulator
        ],
        compiler_params=pltpu.CompilerParams(
            dimension_semantics=("parallel", "parallel", "parallel", "arbitrary"),
            vmem_limit_bytes=_VMEM_LIMIT,
        ),
    )(q, k, v)


# ----------------------------- full module ----------------------------------
def init_mha_params(key, d_model):
    """Deterministic parameter init. Weights stored as (in, out)."""
    ks = jax.random.split(key, 8)
    bound = 1.0 / (d_model ** 0.5)

    def w(k):
        return jax.random.uniform(k, (d_model, d_model), jnp.float32, -bound, bound)

    def b(k):
        return jax.random.uniform(k, (d_model,), jnp.float32, -bound, bound)

    return {
        "wq": w(ks[0]), "bq": b(ks[1]),
        "wk": w(ks[2]), "bk": b(ks[3]),
        "wv": w(ks[4]), "bv": b(ks[5]),
        "wc": w(ks[6]), "bc": b(ks[7]),
    }


def prepare_mha_params(params, n_head, compute_dtype=jnp.bfloat16):
    """One-time weight staging (hoisted out of the forward path):
    stack Q/K/V weights, fold the 1/sqrt(d) softmax scale into W_q/b_q,
    cast matmul operands to bf16 (biases stay fp32 for the fp32 epilogue)."""
    D = params["wq"].shape[0]
    d = D // n_head
    scale = 1.0 / (d ** 0.5)
    w3 = jnp.stack([params["wq"] * scale,
                    params["wk"],
                    params["wv"]]).astype(compute_dtype)              # (3, D, D)
    b3 = jnp.stack([params["bq"] * scale,
                    params["bk"],
                    params["bv"]])[:, None, :].astype(jnp.float32)    # (3, 1, D)
    wc = params["wc"].astype(compute_dtype)[None]                     # (1, D, D)
    bc = params["bc"].astype(jnp.float32)[None, None, :]              # (1, 1, D)
    return {"n_head": n_head, "w3": w3, "b3": b3, "wc": wc, "bc": bc}


def multi_head_attention(Q, K, V, prepared, mask=None):
    if mask is not None:
        # TODO(synk): masked_fill branch of ScaledDotProductAttention not implemented.
        raise NotImplementedError("mask is not supported")

    n_head = prepared["n_head"]
    B, L, D = Q.shape
    d = D // n_head
    cd = prepared["w3"].dtype
    out_dtype = Q.dtype

    # ---- fused Q/K/V projection: ONE pallas_call over a stacked-3 grid axis
    x3 = jnp.stack([Q.reshape(B * L, D),
                    K.reshape(B * L, D),
                    V.reshape(B * L, D)]).astype(cd)                  # (3, B*L, D)
    qkv = stacked_linear(x3, prepared["w3"], prepared["b3"], out_dtype=cd)

    # split == torch .view(B, n_head, L, d): pure reshape of contiguous buffer
    qh = qkv[0].reshape(B, n_head, L, d)
    kh = qkv[1].reshape(B, n_head, L, d)
    vh = qkv[2].reshape(B, n_head, L, d)

    o = scaled_dot_product_attention(qh, kh, vh, exp_dtype=_EXP_DTYPE)

    # concat == torch .view(B, L, D): inverse pure reshape
    o2 = o.reshape(B * L, D)
    out = stacked_linear(o2[None], prepared["wc"], prepared["bc"],
                         out_dtype=out_dtype)                         # (1, B*L, D)
    return out[0].reshape(B, L, D)


# ---------------------------- pure-JAX reference ----------------------------
def _reference(Q, K, V, params, n_head):
    """Mirrors the module's math (bf16 MXU operands, fp32 accumulation)."""
    B, L, D = Q.shape
    d = D // n_head
    cd = jnp.bfloat16

    def lin(x, w, b):
        y = jnp.dot(x.astype(cd), w.astype(cd),
                    preferred_element_type=jnp.float32) + b
        return y.astype(cd)

    q = lin(Q.reshape(B * L, D), params["wq"], params["bq"]).reshape(B, n_head, L, d)
    k = lin(K.reshape(B * L, D), params["wk"], params["bk"]).reshape(B, n_head, L, d)
    v = lin(V.reshape(B * L, D), params["wv"], params["bv"]).reshape(B, n_head, L, d)
    s = jnp.einsum("bhqd,bhkd->bhqk", q, k,
                   preferred_element_type=jnp.float32) / (d ** 0.5)
    p = jax.nn.softmax(s, axis=-1)
    o = jnp.einsum("bhqk,bhkd->bhqd", p.astype(cd), v,
                   preferred_element_type=jnp.float32)
    o = o.astype(cd).reshape(B * L, D)
    out = jnp.dot(o, params["wc"].astype(cd),
                  preferred_element_type=jnp.float32) + params["bc"]
    return out.reshape(B, L, D)


def _run_and_check(B, L, D, H, seed, tol):
    key = jax.random.PRNGKey(seed)
    kq, kk, kv_, kp = jax.random.split(key, 4)
    Q = jax.random.normal(kq, (B, L, D), jnp.float32)
    K = jax.random.normal(kk, (B, L, D), jnp.float32)
    V = jax.random.normal(kv_, (B, L, D), jnp.float32)
    params = init_mha_params(kp, D)
    prepared = prepare_mha_params(params, H)

    out = multi_head_attention(Q, K, V, prepared)
    out = jax.block_until_ready(out)

    ref = _reference(Q, K, V, params, H)
    assert out.shape == (B, L, D)
    err = float(jnp.max(jnp.abs(out - ref)))
    assert jnp.allclose(out, ref, atol=tol, rtol=tol), (
        f"mismatch vs reference at (B={B}, L={L}, D={D}, H={H}): max abs err {err}")


if __name__ == "__main__":
    # bf16-exp path (v6e/v7x) is slightly less exact than the fp32 path (v5e).
    tol = 3e-2 if _EXP_DTYPE == jnp.bfloat16 else 2e-2
    # small shape (matches the original toy config)
    _run_and_check(B=2, L=8, D=32, H=4, seed=0, tol=tol)
    # larger shape exercising per-head grid parallelism and the big-tile linears
    _run_and_check(B=2, L=256, D=512, H=8, seed=1, tol=tol)
    print("KERNEL_OK")
</pallas_src>

<mosaic_0001>
module attributes {stable_mosaic.version = 11 : i64} {
  func.func @_stacked_linear_kernel(%arg0: i32, %arg1: i32, %arg2: i32, %arg3: i32, %arg4: memref<1x16x32xbf16, #tpu.memory_space<vmem>>, %arg5: memref<1x32x32xbf16, #tpu.memory_space<vmem>>, %arg6: memref<1x1x32xf32, #tpu.memory_space<vmem>>, %arg7: memref<1x16x32xbf16, #tpu.memory_space<vmem>>, %arg8: memref<16x32xf32, #tpu.memory_space<vmem>>) attributes {dimension_semantics = [#tpu.dimension_semantics<parallel>, #tpu.dimension_semantics<parallel>, #tpu.dimension_semantics<parallel>, #tpu.dimension_semantics<arbitrary>], iteration_bounds = array<i64: 3, 1, 1, 1>, scalar_prefetch = 0 : i64, scratch_operands = 1 : i64, tpu.core_type = #tpu.core_type<tc>, window_params = [{transform_indices = @transform_0, window_bounds = array<i64: 1, 16, 32>}, {transform_indices = @transform_1, window_bounds = array<i64: 1, 32, 32>}, {transform_indices = @transform_2, window_bounds = array<i64: 1, 1, 32>}, {transform_indices = @transform_3, window_bounds = array<i64: 1, 16, 32>}]} {
    %c0_i32 = arith.constant 0 : i32
    %0 = arith.cmpi eq, %arg3, %c0_i32 : i32
    %1 = arith.extui %0 : i1 to i32
    %c0_i32_0 = arith.constant 0 : i32
    %2 = arith.cmpi ne, %1, %c0_i32_0 : i32
    scf.if %2 {
      %cst_12 = arith.constant 0.000000e+00 : f32
      %14 = vector.broadcast %cst_12 : f32 to vector<16x32xf32>
      %c0_13 = arith.constant 0 : index
      %c0_14 = arith.constant 0 : index
      %15 = vector.load %arg8[%c0_13, %c0_14] : memref<16x32xf32, #tpu.memory_space<vmem>>, vector<16x32xf32>
      tpu.vector_store %arg8[%c0_13, %c0_14], %14 {strides = array<i32>} : memref<16x32xf32, #tpu.memory_space<vmem>>, vector<16x32xf32>,
    } else {
    }
    %c0 = arith.constant 0 : index
    %c0_1 = arith.constant 0 : index
    %3 = vector.load %arg8[%c0, %c0_1] : memref<16x32xf32, #tpu.memory_space<vmem>>, vector<16x32xf32>
    %c0_2 = arith.constant 0 : index
    %c0_3 = arith.constant 0 : index
    %c0_4 = arith.constant 0 : index
    %4 = vector.load %arg4[%c0_2, %c0_3, %c0_4] : memref<1x16x32xbf16, #tpu.memory_space<vmem>>, vector<1x16x32xbf16>
    %5 = vector.shape_cast %4 : vector<1x16x32xbf16> to vector<16x32xbf16>
    %c0_5 = arith.constant 0 : index
    %c0_6 = arith.constant 0 : index
    %c0_7 = arith.constant 0 : index
    %6 = vector.load %arg5[%c0_5, %c0_6, %c0_7] : memref<1x32x32xbf16, #tpu.memory_space<vmem>>, vector<1x32x32xbf16>
    %7 = vector.shape_cast %6 : vector<1x32x32xbf16> to vector<32x32xbf16>
    %cst = arith.constant dense<0.000000e+00> : vector<16x32xf32>
    %8 = tpu.matmul %5, %7, %cst {dimension_numbers = #tpu.dot_dimension_numbers<[1], [0], [0], [1], [0, 0, 1, 1], [], []>} : vector<16x32xbf16>, vector<32x32xbf16>, vector<16x32xf32> -> vector<16x32xf32>
    %9 = arith.addf %3, %8 : vector<16x32xf32>
    %c0_8 = arith.constant 0 : index
    %c0_9 = arith.constant 0 : index
    %10 = vector.load %arg8[%c0_8, %c0_9] : memref<16x32xf32, #tpu.memory_space<vmem>>, vector<16x32xf32>
    tpu.vector_store %arg8[%c0_8, %c0_9], %9 {strides = array<i32>} : memref<16x32xf32, #tpu.memory_space<vmem>>, vector<16x32xf32>,
    %c0_i32_10 = arith.constant 0 : i32
    %11 = arith.cmpi eq, %arg3, %c0_i32_10 : i32
    %12 = arith.extui %11 : i1 to i32
    %c0_i32_11 = arith.constant 0 : i32
    %13 = arith.cmpi ne, %12, %c0_i32_11 : i32
    scf.if %13 {
      %c0_12 = arith.constant 0 : index
      %c0_13 = arith.constant 0 : index
      %14 = vector.load %arg8[%c0_12, %c0_13] : memref<16x32xf32, #tpu.memory_space<vmem>>, vector<16x32xf32>
      %c0_14 = arith.constant 0 : index
      %c0_15 = arith.constant 0 : index
      %c0_16 = arith.constant 0 : index
      %15 = vector.load %arg6[%c0_14, %c0_15, %c0_16] : memref<1x1x32xf32, #tpu.memory_space<vmem>>, vector<1x1x32xf32>
      %16 = vector.shape_cast %15 : vector<1x1x32xf32> to vector<1x32xf32>
      %17 = vector.broadcast %16 : vector<1x32xf32> to vector<16x32xf32>
      %18 = arith.addf %14, %17 : vector<16x32xf32>
      %19 = arith.truncf %18 : vector<16x32xf32> to vector<16x32xbf16>
      %c0_17 = arith.constant 0 : index
      %c0_18 = arith.constant 0 : index
      %c0_19 = arith.constant 0 : index
      %20 = vector.load %arg7[%c0_17, %c0_18, %c0_19] : memref<1x16x32xbf16, #tpu.memory_space<vmem>>, vector<1x16x32xbf16>
      %21 = vector.shape_cast %20 : vector<1x16x32xbf16> to vector<16x32xbf16>
      %22 = vector.shape_cast %19 : vector<16x32xbf16> to vector<1x16x32xbf16>
      tpu.vector_store %arg7[%c0_17, %c0_18, %c0_19], %22 {strides = array<i32>} : memref<1x16x32xbf16, #tpu.memory_space<vmem>>, vector<1x16x32xbf16>,
    } else {
    }
    return
  }
  func.func @transform_0(%arg0: i32, %arg1: i32, %arg2: i32, %arg3: i32) -> (i32, i32, i32) {
    %c0_i32 = arith.constant 0 : i32
    return %arg0, %arg1, %arg3 : i32, i32, i32
  }
  func.func @transform_1(%arg0: i32, %arg1: i32, %arg2: i32, %arg3: i32) -> (i32, i32, i32) {
    %c0_i32 = arith.constant 0 : i32
    return %arg0, %arg3, %arg2 : i32, i32, i32
  }
  func.func @transform_2(%arg0: i32, %arg1: i32, %arg2: i32, %arg3: i32) -> (i32, i32, i32) {
    %c0_i32 = arith.constant 0 : i32
    %c0_i32_0 = arith.constant 0 : i32
    return %arg0, %c0_i32, %arg2 : i32, i32, i32
  }
  func.func @transform_3(%arg0: i32, %arg1: i32, %arg2: i32, %arg3: i32) -> (i32, i32, i32) {
    %c0_i32 = arith.constant 0 : i32
    return %arg0, %arg1, %arg2 : i32, i32, i32
  }
}

</mosaic_0001>

<bundles_post_ra>
// kernel: tpu_custom_call.1
= control target key start
LH: loop header
LB: loop body
LE: loop exit
PB: predicated region body
PF: predicated region fallthrough
CT: control target
= control target key end

     0   :  { %8 = vsyncpa [#allocation4], 0  ;;  %s1097_s0 = inlined_call_operand.hbm [shape: bf16[3,16,32], index: 0, kind: input, shape index: {}]   ;;  %s1098_s1 = inlined_call_operand.hbm [shape: bf16[3,32,32], index: 1, kind: input, shape index: {}]   ;;  %s1099_s2 = inlined_call_operand.vmem [shape: f32[3,1,32], index: 2, kind: input, shape index: {}]   ;;  %s1100_s3 = inlined_call_operand.hbm [shape: bf16[3,16,32], index: 3, kind: output, shape index: {}]  }
   0x1   :  { %10 = vsyncpa [#allocation4 + $0x1], 0 }
   0x2   :  { %11 = vsyncpa [#allocation7], 0 }
   0x3   :  { %13 = vsyncpa [#allocation7 + $0x1], 0 }
   0x4   :  { %14 = vsyncpa [#allocation5], 0 }
   0x5   :  { %16 = vsyncpa [#allocation5 + $0x1], 0  ;;  %s854_s12 = smov 0   ;;  %s856_s13 = smov 0  }
   0x6   :  { %s858_s14 = smov 0   ;;  %s860_s15 = smov 0  }
   0x7   :  { %s862_s16 = smov 0   ;;  %s864_s17 = smov 0  }
   0x8 LB: > { %s559_s18 = sadd.s32 4294967295, %s823_s17   ;;  %s560_s19 = sadd.s32 4294967294, %s823_s17   ;;  %s823_s17 = sphi %s864_s17, %s22_s17   ;;  %s819_s16 = sphi %s862_s16, %s1117_s16   ;;  %s815_s15 = sphi %s860_s15, %s1116_s15   ;;  %s811_s14 = sphi %s858_s14, %s1115_s14   ;;  %s807_s13 = sphi %s856_s13, %s1114_s13   ;;  %s803_s12 = sphi %s854_s12, %s1113_s12  }
   0x9   : > { %s48_s20 = sadd.s32 1, %s819_s16  ;;  %s59_s21 = sadd.s32 1, %s811_s14 }
   0xa   : > { %p50_p0 = scmp.ge.s32.totalorder %s48_s20, 3  ;;  %p66_p1 = scmp.ne.s32.totalorder %s811_s14, %s807_s13 }
   0xb   : > { %p67_p2 = scmp.eq.s32.totalorder %s823_s17, 0  ;;  %p72_p3 = scmp.ne.s32.totalorder %s807_s13, %s803_s12 }
   0xc   : > { %s1119_s20 = smov (%p50_p0, %s48_s20), 0  ;;  %p73_p5 = scmp.eq.s32.totalorder %s559_s18, 0 }
   0xd   : > { %p895_p4 = por %p67_p2, %p66_p1  ;;  %s52_s23 = ssub.s32 %s819_s16, %s1119_s20 }
   0xe   : > { %p158_p6 = scmp.eq.s32.totalorder %s559_s18, 2  ;;  %p57_p7 = scmp.eq.s32.totalorder %s52_s23, 0 }
   0xf   : > { %p901_p8 = por %p73_p5, %p72_p3  ;;  %p164_p10 = scmp.eq.s32.totalorder %s560_s19, 2 }
  0x10   : > { %p905_p9 = por %p158_p6, %p66_p1  ;;  %p618_p12 = scmp.lt.s32.totalorder %s823_s17, 3 }
  0x11   : > { %s1104_s24 = scalar_select %p901_p8, 1, 0 }
  0x12   : > { %s1105_s25 = scalar_select %p905_p9, 1, 0 }
  0x13   : > { %s910_s26 = scalar_select %p57_p7, %s811_s14, %s59_s21  }
  0x14   : > { %p912_p11 = por %p164_p10, %p72_p3  ;;  %s918_s28 = sand.u32 1, %s811_s14  }
  0x15   : > { %s563_s29 = sshll.u32 %s918_s28, 3  ;;  %s585_s30 = sshll.u32 %s819_s16, 7 }
  0x16   : > { %s1106_s27 = scalar_select %p912_p11, 1, 0 }
  0x17   : > { %s925_s6 = scalar_lea.hbm %s1097_s0, %s585_s30  ;;  %s188_s7 = scalar_lea.vmem [#allocation3], %s563_s29 }
  0x18   : > { %s198_s8 = sshll.u32 %s188_s7, 4  ;;  %p931_p13 = pnand %p618_p12, %p895_p4  ;;  %s927_s8 = int_to_ptr.vmem [resolvable:$true] %s198_s8 }
  0x19   : > { %s185_s10 = scalar_lea.sflag [#allocation4], %s918_s28  ;;  %s677_s11 = scalar_lea.hbm %s925_s6, 128 }
  0x1a   : > { %p678_p1 = scmp.ne.s32.totalorder %s925_s6, %s677_s11  ;;  %p679_p2 = pneg %p931_p13 }
  0x1b   : > { %s682_s21 = scalar_lea.hbm %s1097_s0, 384  ;;  %p683_p4 = scmp.lt.u32.totalorder %s925_s6, %s1097_s0 }
  0x1c   : > { %p680_p3 = pnand %p679_p2, %p678_p1  ;;  %p684_p6 = scmp.lt.u32.totalorder %s682_s21, %s677_s11 }
  0x1d   : > { %p686_p10 = scmp.lt.u32.totalorder %s677_s11, %s925_s6 }
  0x1e   : > { %p681_p5 = pneg %p680_p3  ;;  %p685_p7 = por %p684_p6, %p683_p4 }
  0x20   : > { %p687_p12 = por %p686_p10, %p685_p7 }
  0x22   : > { %p688_p0 = pnand %p687_p12, %p681_p5 }
  0x24   : > { %691 = shalt.err (!%p688_p0)
}
  0x25   : > { %s692_s29 = scalar_lea.vmem %s927_s8, 128  ;;  %s825_s30 = smov [#allocation3]  }
  0x26   : > { %p693_p1 = scmp.ne.s32.totalorder %s927_s8, %s692_s29  ;;  %s697_s4 = sshll.u32 %s825_s30, 4  ;;  %s698_s4 = int_to_ptr.vmem [resolvable:$false] %s697_s4 }
  0x27   : > { %s699_s5 = scalar_lea.vmem %s698_s4, 256  ;;  %p700_p9 = scmp.lt.s32.totalorder %s927_s8, %s698_s4 }
  0x28   : > { %p695_p3 = pnand %p693_p1, %p679_p2  ;;  %p701_p4 = scmp.lt.s32.totalorder %s699_s5, %s692_s29 }
  0x2a   : > { %p696_p11 = pneg %p695_p3  ;;  %p702_p6 = por %p701_p4, %p700_p9 }
  0x2c   : > { %p703_p7 = pnand %p702_p6, %p696_p11 }
  0x2e   : > { %706 = shalt.err (!%p703_p7)
}
  0x2f   : > { %s826_s7 = smov 64   ;;  %s827_s11 = smov 4  }
  0x30   : > { %610 = dma.hbm_to_vmem [thread:$0]  (!%p931_p13), %s925_s6, 128, %s927_s8, %s185_s10, %s826_s7, %s826_s7, %s827_s11  }
  0x31   : > { %p239_p9 = scmp.lt.s32.totalorder %s823_s17, 4  ;;  %s566_s18 = sshll.u32 %s918_s28, 4 }
  0x32   : > { %s586_s19 = sshll.u32 %s819_s16, 8  ;;  %p1108_p11 = scmp.ge.s32.totalorder %s823_s17, 1 }
  0x33   : > { %s979_s29 = scalar_lea.hbm %s1098_s1, %s586_s19  ;;  %s212_s30 = scalar_lea.vmem [#allocation6], %s566_s18 }
  0x34   : > { %p972_p0 = pnand %p1108_p11, %p239_p9  ;;  %s222_s4 = sshll.u32 %s212_s30, 4  ;;  %s981_s4 = int_to_ptr.vmem [resolvable:$true] %s222_s4 }
  0x35   : > { %s209_s6 = scalar_lea.sflag [#allocation7], %s918_s28  ;;  %s707_s8 = scalar_lea.hbm %s979_s29, 256 }
  0x36   : > { %p708_p5 = scmp.ne.s32.totalorder %s979_s29, %s707_s8  ;;  %s712_s19 = scalar_lea.hbm %s1098_s1, 768 }
  0x37   : > { %p713_p1 = scmp.lt.u32.totalorder %s979_s29, %s1098_s1  ;;  %p714_p3 = scmp.lt.u32.totalorder %s712_s19, %s707_s8 }
  0x38   : > { %p710_p10 = pnand %p708_p5, %p679_p2  ;;  %p716_p6 = scmp.lt.u32.totalorder %s707_s8, %s979_s29 }
  0x39   : > { %p715_p4 = por %p714_p3, %p713_p1 }
  0x3a   : > { %p711_p12 = pneg %p710_p10 }
  0x3b   : > { %p717_p7 = por %p716_p6, %p715_p4 }
  0x3d   : > { %p718_p9 = pnand %p717_p7, %p711_p12 }
  0x3f   : > { %721 = shalt.err (!%p718_p9)
}
  0x40   : > { %s722_s18 = scalar_lea.vmem %s981_s4, 256  ;;  %s828_s30 = smov [#allocation6]  }
  0x41   : > { %p723_p11 = scmp.ne.s32.totalorder %s981_s4, %s722_s18  ;;  %s727_s10 = sshll.u32 %s828_s30, 4  ;;  %s728_s10 = int_to_ptr.vmem [resolvable:$false] %s727_s10 }
  0x42   : > { %s729_s5 = scalar_lea.vmem %s728_s10, 512  ;;  %p730_p8 = scmp.lt.s32.totalorder %s981_s4, %s728_s10 }
  0x43   : > { %p725_p5 = pnand %p723_p11, %p679_p2  ;;  %p731_p1 = scmp.lt.s32.totalorder %s729_s5, %s722_s18 }
  0x45   : > { %p726_p10 = pneg %p725_p5  ;;  %p732_p3 = por %p731_p1, %p730_p8 }
  0x47   : > { %p733_p4 = pnand %p732_p3, %p726_p10 }
  0x49   : > { %736 = shalt.err (!%p733_p4)
}
  0x4a   : > { %613 = dma.hbm_to_vmem [thread:$0]  (!%p931_p13), %s979_s29, 256, %s981_s4, %s209_s6, %s826_s7, %s826_s7, %s827_s11  }
  0x4b   : > { %243 = sbr.rel (%p972_p0) target bundleno = 338 (0x152), region = 32  ;;  %s1015_s8 = sand.u32 (!%p972_p0), 1, %s807_s13  }
  0x4c   : > { %s570_s19 = sshll.u32 (!%p972_p0), %s1015_s8, 3  ;;  %s246_s9 = scalar_lea.sflag (!%p972_p0), [#allocation4], %s1015_s8 }
  0x4d   : > { %s249_s22 = scalar_lea.vmem (!%p972_p0), [#allocation3], %s570_s19  ;;  %p1110_p8 = scmp.ne.s32.totalorder (!%p972_p0), %s1104_s24, 0 }
  0x52   : > { %790 = dma.done.wait (%p1110_p8), %s246_s9, 128  }
  0x53   : > { %792 = vsyncadd (%p1110_p8), %s246_s9, 4294967168  ;;  %s571_s28 = sshll.u32 %s1015_s8, 4  ;;  %s255_s7 = scalar_lea.sflag [#allocation7], %s1015_s8 }
  0x54   : > { %s258_s11 = scalar_lea.vmem [#allocation6], %s571_s28 }
  0x55   : > { %794 = dma.done.wait (%p1110_p8), %s255_s7, 256  }
  0x56   : > { %796 = vsyncadd (%p1110_p8), %s255_s7, 4294967040  ;;  %vm306_vm0 = vcmask 261120   ;;  %v829_v0 = vmov 0.0   ;;  %vm830_vm1 = vmmov 0   ;;  %v674_v1 = vld [vmem:[%s258_s11] sm:$0xff]   ;;  %v675_v2 = vld [vmem:[%s258_s11 + $0x8] sm:$0xff]  }
  0x57   : > { %593 = vmatprep.subr.bf16.mxu0 %v829_v0  ;;  %597 = vmatprep.mubr.msk.bf16.mxu0 %vm830_vm1, %v829_v0  ;;  %307 = vst.msk [vmem:[#allocation2] sm:$0xff] %vm306_vm0, %v829_v0  ;;  %308 = vst.msk [vmem:[#allocation2 + $0x8] sm:$0xff] %vm306_vm0, %v829_v0  ;;  %v676_v3 = vld [vmem:[%s249_s22] sm:$0xff]   ;;  %p294_p13 = scmp.lt.s32.totalorder %s815_s15, 2  ;;  %s589_s6 = sshll.u32 %s815_s15, 7  ;;  %vm405_vm2 = vcmask 257024  }
  0x58   : > { %594 = vmatpush3.bf16.msra.mxu0 %v674_v1  ;;  %s291_s23 = scalar_lea.vmem [#allocation8], %s570_s19  ;;  %s1047_s5 = scalar_lea.hbm %s1100_s3, %s589_s6 }
  0x59   : > { %595 = vmatprep.subr.bf16.mxu0 %v829_v0  ;;  %s295_s24 = scalar_select %p294_p13, %s815_s15, 2 }
  0x5a   : > { %s425_s18 = sshll.u32 %s291_s23, 4  ;;  %s409_s15 = scalar_lea.sflag [#allocation5], %s1015_s8  ;;  %s1049_s18 = int_to_ptr.vmem [resolvable:$true] %s425_s18 }
  0x5b   : > { %s299_s4 = scalar_lea.vmem %s1099_s2, %s295_s24  ;;  %s737_s19 = scalar_lea.vmem %s1049_s18, 128 }
  0x5c   : > { %596 = vmatpush3.bf16.msra.mxu0 %v675_v2  ;;  %v577_v12 = vld [vmem:[%s299_s4] ss:$0 sm:$0xff]  ;;  %p738_p2 = scmp.ne.s32.totalorder %s1049_s18, %s737_s19  ;;  %p1111_p0 = scmp.ne.s32.totalorder %s1105_s25, 0 }
  0x5d   : > { %s831_s9 = smov [#allocation8]  }
  0x5e   : > { %v309_v4 = vld [vmem:[#allocation2] sm:$0xff]  ;;  %v310_v6 = vld [vmem:[#allocation2 + $0x8] sm:$0xff]  ;;  %p739_p12 = pnand %p738_p2, %p1111_p0  ;;  %s741_s22 = sshll.u32 %s831_s9, 4  ;;  %s742_s22 = int_to_ptr.vmem [resolvable:$false] %s741_s22 }
  0x5f   : > { %598 = vmatmul.mubr.msk.bf16.vlgmr.msra.gmra.mrb[0].mxu0 %vm306_vm0, %v676_v3  ;;  %s743_s28 = scalar_lea.vmem %s742_s22, 256  ;;  %p744_p7 = scmp.lt.s32.totalorder %s1049_s18, %s742_s22 }
  0x60   : > { %p740_p6 = pneg %p739_p12  ;;  %p745_p9 = scmp.lt.s32.totalorder %s743_s28, %s737_s19 }
  0x62   : > { %p746_p11 = por %p745_p9, %p744_p7 }
  0x64   : > { %p747_p5 = pnand %p746_p11, %p740_p6 }
 0x132   : > { %v372_v5 = vpop.f32.mrb[0].mxu0 }
 0x133   : > { %v379_v7 = vadd.f32 %v372_v5, %v309_v4  ;;  %v599_v8 = vpop.f32.mrb[1].mxu0 }
 0x134   : > { %v375_v9 = vpop.f32.mrb[2].mxu0 }
 0x135   : > { %381 = vst.msk [vmem:[#allocation2] sm:$0xff] %vm306_vm0, %v379_v7  ;;  %v380_v10 = vadd.f32 %v375_v9, %v310_v6  ;;  %v600_v11 = vpop.f32.mrb[3].mxu0 }
 0x137   : > { %382 = vst.msk [vmem:[#allocation2 + $0x8] sm:$0xff] %vm306_vm0, %v380_v10 }
 0x13c   : > { %v386_v13 = vld [vmem:[#allocation2] sm:$0xff] }
 0x13d   : > { %v395_v14 = vadd.f32 %v577_v12, %v386_v13 }
 0x13e   : > { %v387_v15 = vld [vmem:[#allocation2 + $0x8] sm:$0xff] }
 0x13f   : > { %v396_v16 = vadd.f32 %v577_v12, %v387_v15  ;;  %v587_v17 = vpack.c.bf16 %v395_v14, %v395_v14 }
 0x141   : > { %v588_v18 = vpack.c.bf16 %v396_v16, %v396_v16  ;;  %406 = vst.msk [vmem:[%s291_s23] sm:$0xf] %vm405_vm2, %v587_v17 }
 0x143   : > { %407 = vst.msk [vmem:[%s291_s23 + $0x4] sm:$0xf] %vm405_vm2, %v588_v18 }
 0x144   : > { %750 = shalt.err (!%p747_p5)
}
 0x145   : > { %s751_s7 = scalar_lea.hbm %s1047_s5, 128  ;;  %s755_s21 = scalar_lea.hbm %s1100_s3, 384 }
 0x146   : > { %p752_p10 = scmp.ne.s32.totalorder %s1047_s5, %s751_s7  ;;  %p756_p4 = scmp.lt.u32.totalorder %s1047_s5, %s1100_s3 }
 0x147   : > { %p757_p8 = scmp.lt.u32.totalorder %s755_s21, %s751_s7  ;;  %p759_p2 = scmp.lt.u32.totalorder %s751_s7, %s1047_s5 }
 0x148   : > { %p753_p1 = pnand %p752_p10, %p1111_p0 }
 0x149   : > { %p758_p13 = por %p757_p8, %p756_p4 }
 0x14a   : > { %p754_p3 = pneg %p753_p1 }
 0x14b   : > { %p760_p12 = por %p759_p2, %p758_p13 }
 0x14d   : > { %p761_p6 = pnand %p760_p12, %p754_p3 }
 0x14f   : > { %764 = shalt.err (!%p761_p6)
}
 0x150   : > { %s832_s6 = smov 64   ;;  %s833_s23 = smov 4  }
 0x151   : > { %605 = dma.vmem_to_hbm [thread:$0]  (%p1111_p0), %s1049_s18, 128, %s1047_s5, %s409_s15, %s832_s6, %s832_s6, %s833_s23  }
 0x152 PF: > { %p619_p7 = scmp.ge.s32.totalorder %s823_s17, 2  ;;  %s440_s30 = sand.u32 1, %s803_s12  }
 0x153   : > { %p1112_p9 = scmp.ne.s32.totalorder %s1106_s27, 0  ;;  %s441_s10 = scalar_lea.sflag [#allocation5], %s440_s30 }
 0x155   : > { %p615_p11 = pnand %p619_p7, %p1112_p9 }
 0x157   : > { %798 = dma.done.wait (!%p615_p11), %s441_s10, 128  }
 0x158   : > { %800 = vsyncadd (!%p615_p11), %s441_s10, 4294967168  ;;  %s22_s17 = sadd.s32 1, %s823_s17   ;;  %s1113_s12 = smov %s807_s13 }
 0x159   : > { %p19_p5 = scmp.ge.s32.totalorder %s22_s17, 5   ;;  %s1114_s13 = smov %s811_s14 }
 0x15a   : > { %s1115_s14 = smov %s910_s26  ;;  %s1116_s15 = smov %s819_s16 }
 0x15b   : > { %s1117_s16 = smov %s1119_s20  ;;  %21 = sbr.rel (!%p19_p5) target bundleno = 8 (0x8), region = 101 }
 0x162   :  { %446 = vsyncpa [#allocation4], 1 }
 0x163   :  { %448 = vsyncpa [#allocation4 + $0x1], 1 }
 0x164   :  { %449 = vsyncpa [#allocation7], 1 }
 0x165   :  { %451 = vsyncpa [#allocation7 + $0x1], 1 }
 0x166   :  { %452 = vsyncpa [#allocation5], 1 }
 0x167   :  { %454 = vsyncpa [#allocation5 + $0x1], 1 }

</bundles_post_ra>
